<compile_context>
chip_gen: v7x
topology: tpu7x:2x2x1
jax: 0.10.0
libtpu: 0.0.40
codegen_flags: <defaults>
</compile_context>

<pallas_src>
import functools
import math

import jax
import jax.numpy as jnp
from jax.experimental import pallas as pl
from jax.experimental.pallas import tpu as pltpu

_INV_LOG2 = 1.0 / math.log(2.0)


def _ce_loss_pcs_kernel(pred_ref, tgt_ref, psym_ref, out_ref, acc_ref,
                        *, n_rows, block_rows):
    step = pl.program_id(0)
    n_steps = pl.num_programs(0)

    @pl.when(step == 0)
    def _init():
        acc_ref[0, 0] = 0.0

    # ---- per-tile cross-entropy partial sum ----
    preds = pred_ref[...].astype(jnp.float32)      # (TM, C) logits
    tgt = tgt_ref[...]                             # (TM, 1) int32 class indices

    m = jnp.max(preds, axis=-1, keepdims=True)                                 # (TM, 1)
    lse = jnp.log(jnp.sum(jnp.exp(preds - m), axis=-1, keepdims=True)) + m     # (TM, 1)
    col = jax.lax.broadcasted_iota(jnp.int32, preds.shape, 1)                  # (TM, C)
    picked = jnp.sum(jnp.where(col == tgt, preds, 0.0),
                     axis=-1, keepdims=True)                                   # (TM, 1)
    nll = lse - picked                                                         # (TM, 1)

    # Mask rows past N (last tile may be a partial block).
    row = jax.lax.broadcasted_iota(jnp.int32, nll.shape, 0) + step * block_rows
    tile_sum = jnp.sum(jnp.where(row < n_rows, nll, 0.0))

    acc_ref[0, 0] = acc_ref[0, 0] + tile_sum

    # ---- finalize: mean CE minus symbol entropy, only on the last step ----
    @pl.when(step == n_steps - 1)
    def _finalize():
        psym = psym_ref[...].astype(jnp.float32)   # (1, M)
        plogp = jnp.where(psym > 0.0, psym * jnp.log(psym), 0.0)
        ent = -jnp.sum(plogp) * _INV_LOG2          # entropy in bits
        out_ref[0, 0] = acc_ref[0, 0] * (1.0 / n_rows) - ent


def _pick_block_rows(n, c, itemsize):
    """Row-tile size: multiple of 8, sized so double-buffered prediction tiles
    stay well below even v7x's 64 MiB VMEM (target ~4 MiB per tile)."""
    budget_bytes = 4 * 1024 * 1024
    tm = budget_bytes // max(1, c * itemsize)
    tm = min(tm, n)
    tm = (tm // 8) * 8
    if tm < 8:
        tm = n          # tiny batch: single full-array block
    return tm


def ce_loss_for_pcs(predictions, targets, p_sym, *, block_rows=None):
    """predictions: (N, C) float logits (f32 or bf16, passed through untouched);
    targets: (N,) integer class indices; p_sym: (M,) float probabilities."""
    n, c = predictions.shape
    m = p_sym.shape[0]

    if block_rows is None:
        block_rows = _pick_block_rows(n, c, predictions.dtype.itemsize)
    block_rows = min(block_rows, n)
    if block_rows != n and block_rows % 8 != 0:
        block_rows = max(8, (block_rows // 8) * 8)
    grid_steps = pl.cdiv(n, block_rows)

    tgt2d = targets.astype(jnp.int32).reshape(n, 1)
    psym2d = p_sym.reshape(1, m)

    kernel = functools.partial(
        _ce_loss_pcs_kernel, n_rows=n, block_rows=block_rows)

    cost = pl.CostEstimate(
        flops=5 * n * c,
        transcendentals=n * c + m,
        bytes_accessed=(n * c * predictions.dtype.itemsize
                        + n * 4 + m * psym2d.dtype.itemsize + 4),
    )

    out = pl.pallas_call(
        kernel,
        out_shape=jax.ShapeDtypeStruct((1, 1), jnp.float32),
        grid_spec=pltpu.PrefetchScalarGridSpec(
            num_scalar_prefetch=0,
            grid=(grid_steps,),
            in_specs=[
                pl.BlockSpec((block_rows, c), lambda i: (i, 0)),
                pl.BlockSpec((block_rows, 1), lambda i: (i, 0)),
                pl.BlockSpec((1, m), lambda i: (0, 0)),
            ],
            out_specs=pl.BlockSpec(memory_space=pltpu.MemorySpace.SMEM),
            scratch_shapes=[pltpu.SMEM((1, 1), jnp.float32)],
        ),
        compiler_params=pltpu.CompilerParams(
            dimension_semantics=("arbitrary",),   # reduction over row tiles
        ),
        cost_estimate=cost,
    )(predictions, tgt2d, psym2d)
    return out[0, 0]


def _reference(predictions, targets, p_sym):
    # Plain-JAX reference matching torch.nn.CrossEntropyLoss (mean reduction)
    logp = jax.nn.log_softmax(predictions.astype(jnp.float32), axis=-1)
    ce = -jnp.mean(jnp.take_along_axis(logp, targets[:, None], axis=-1))
    ent = -jnp.sum(p_sym * jnp.log2(p_sym))
    return ce - ent


if __name__ == "__main__":
    key = jax.random.PRNGKey(0)
    k1, k2, k3 = jax.random.split(key, 3)

    # N deliberately not a multiple of the row tile to exercise partial-tile
    # masking; block_rows=16 forces a 4-step pipelined grid even at toy size.
    N, C, M = 56, 32, 32
    predictions = jax.random.normal(k1, (N, C), dtype=jnp.float32)
    targets = jax.random.randint(k2, (N,), 0, C, dtype=jnp.int32)
    p_sym = jax.nn.softmax(jax.random.normal(k3, (M,), dtype=jnp.float32))

    out = ce_loss_for_pcs(predictions, targets, p_sym, block_rows=16)
    out = jax.block_until_ready(out)

    ref = _reference(predictions, targets, p_sym)
    assert jnp.allclose(out, ref, rtol=1e-5, atol=1e-5), (out, ref)
    print("KERNEL_OK")
</pallas_src>

<mosaic_0001>
module attributes {stable_mosaic.version = 11 : i64} {
  func.func @_ce_loss_pcs_kernel(%arg0: i32, %arg1: memref<16x32xf32, #tpu.memory_space<vmem>>, %arg2: memref<16x1xi32, #tpu.memory_space<vmem>>, %arg3: memref<1x32xf32, #tpu.memory_space<vmem>>, %arg4: memref<1x1xf32, #tpu.memory_space<smem>>, %arg5: memref<1x1xf32, #tpu.memory_space<smem>>) attributes {dimension_semantics = [#tpu.dimension_semantics<arbitrary>], iteration_bounds = array<i64: 4>, scalar_prefetch = 0 : i64, scratch_operands = 1 : i64, tpu.core_type = #tpu.core_type<tc>, window_params = [{transform_indices = @transform_0, window_bounds = array<i64: 16, 32>}, {transform_indices = @transform_1, window_bounds = array<i64: 16, 1>}, {pipeline_mode = #tpu.pipeline_mode<synchronous>, transform_indices = @transform_2, window_bounds = array<i64: 1, 32>}, {transform_indices = @transform_3, window_bounds = array<i64: 1, 1>}]} {
    %c0_i32 = arith.constant 0 : i32
    %0 = arith.cmpi eq, %arg0, %c0_i32 : i32
    %1 = arith.extui %0 : i1 to i32
    %c0_i32_0 = arith.constant 0 : i32
    %2 = arith.cmpi ne, %1, %c0_i32_0 : i32
    scf.if %2 {
      %cst_14 = arith.constant 0.000000e+00 : f32
      %c0_15 = arith.constant 0 : index
      %c0_16 = arith.constant 0 : index
      %40 = memref.load %arg5[%c0_15, %c0_16] : memref<1x1xf32, #tpu.memory_space<smem>>
      memref.store %cst_14, %arg5[%c0_15, %c0_16] : memref<1x1xf32, #tpu.memory_space<smem>>
    } else {
    }
    %c0 = arith.constant 0 : index
    %c0_1 = arith.constant 0 : index
    %3 = vector.load %arg1[%c0, %c0_1] : memref<16x32xf32, #tpu.memory_space<vmem>>, vector<16x32xf32>
    %c0_2 = arith.constant 0 : index
    %c0_3 = arith.constant 0 : index
    %4 = vector.load %arg2[%c0_2, %c0_3] : memref<16x1xi32, #tpu.memory_space<vmem>>, vector<16x1xi32>
    %cst = arith.constant dense<0xFF800000> : vector<16xf32>
    %5 = vector.multi_reduction <maximumf>, %3, %cst [1] : vector<16x32xf32> to vector<16xf32>
    %6 = vector.shape_cast %5 : vector<16xf32> to vector<16x1xf32>
    %7 = vector.broadcast %6 : vector<16x1xf32> to vector<16x32xf32>
    %8 = arith.subf %3, %7 : vector<16x32xf32>
    %9 = math.exp %8 : vector<16x32xf32>
    %cst_4 = arith.constant dense<0.000000e+00> : vector<16xf32>
    %10 = vector.multi_reduction <add>, %9, %cst_4 [1] : vector<16x32xf32> to vector<16xf32>
    %11 = vector.shape_cast %10 : vector<16xf32> to vector<16x1xf32>
    %12 = math.log %11 : vector<16x1xf32>
    %13 = arith.addf %12, %6 : vector<16x1xf32>
    %14 = tpu.iota {dimensions = array<i32: 1>} : vector<16x32xi32>
    %15 = vector.broadcast %4 : vector<16x1xi32> to vector<16x32xi32>
    %16 = arith.cmpi eq, %14, %15 : vector<16x32xi32>
    %cst_5 = arith.constant 0.000000e+00 : f32
    %17 = vector.broadcast %cst_5 : f32 to vector<16x32xf32>
    %18 = arith.select %16, %3, %17 : vector<16x32xi1>, vector<16x32xf32>
    %cst_6 = arith.constant dense<0.000000e+00> : vector<16xf32>
    %19 = vector.multi_reduction <add>, %18, %cst_6 [1] : vector<16x32xf32> to vector<16xf32>
    %20 = vector.shape_cast %19 : vector<16xf32> to vector<16x1xf32>
    %21 = arith.subf %13, %20 : vector<16x1xf32>
    %22 = tpu.iota {dimensions = array<i32: 0>} : vector<16x1xi32>
    %c16_i32 = arith.constant 16 : i32
    %23 = arith.muli %arg0, %c16_i32 : i32
    %24 = vector.broadcast %23 : i32 to vector<16x1xi32>
    %25 = arith.addi %22, %24 : vector<16x1xi32>
    %c56_i32 = arith.constant 56 : i32
    %26 = vector.broadcast %c56_i32 : i32 to vector<16x1xi32>
    %27 = arith.cmpi slt, %25, %26 : vector<16x1xi32>
    %cst_7 = arith.constant 0.000000e+00 : f32
    %28 = vector.broadcast %cst_7 : f32 to vector<16x1xf32>
    %29 = arith.select %27, %21, %28 : vector<16x1xi1>, vector<16x1xf32>
    %30 = vector.shape_cast %29 : vector<16x1xf32> to vector<1x16x1xf32>
    %cst_8 = arith.constant dense<0.000000e+00> : vector<1xf32>
    %31 = vector.multi_reduction <add>, %30, %cst_8 [1, 2] : vector<1x16x1xf32> to vector<1xf32>
    %32 = vector.shape_cast %31 : vector<1xf32> to vector<1x1x1xf32>
    %33 = vector.extract %32[0, 0, 0] : f32 from vector<1x1x1xf32>
    %c0_9 = arith.constant 0 : index
    %c0_10 = arith.constant 0 : index
    %34 = memref.load %arg5[%c0_9, %c0_10] : memref<1x1xf32, #tpu.memory_space<smem>>
    %35 = arith.addf %34, %33 : f32
    %c0_11 = arith.constant 0 : index
    %c0_12 = arith.constant 0 : index
    %36 = memref.load %arg5[%c0_11, %c0_12] : memref<1x1xf32, #tpu.memory_space<smem>>
    memref.store %35, %arg5[%c0_11, %c0_12] : memref<1x1xf32, #tpu.memory_space<smem>>
    %c3_i32 = arith.constant 3 : i32
    %37 = arith.cmpi eq, %arg0, %c3_i32 : i32
    %38 = arith.extui %37 : i1 to i32
    %c0_i32_13 = arith.constant 0 : i32
    %39 = arith.cmpi ne, %38, %c0_i32_13 : i32
    scf.if %39 {
      %c0_14 = arith.constant 0 : index
      %c0_15 = arith.constant 0 : index
      %40 = vector.load %arg3[%c0_14, %c0_15] : memref<1x32xf32, #tpu.memory_space<vmem>>, vector<1x32xf32>
      %cst_16 = arith.constant 0.000000e+00 : f32
      %41 = vector.broadcast %cst_16 : f32 to vector<1x32xf32>
      %42 = arith.cmpf ogt, %40, %41 : vector<1x32xf32>
      %43 = math.log %40 : vector<1x32xf32>
      %44 = arith.mulf %40, %43 : vector<1x32xf32>
      %cst_17 = arith.constant 0.000000e+00 : f32
      %45 = vector.broadcast %cst_17 : f32 to vector<1x32xf32>
      %46 = arith.select %42, %44, %45 : vector<1x32xi1>, vector<1x32xf32>
      %47 = vector.shape_cast %46 : vector<1x32xf32> to vector<1x1x32xf32>
      %cst_18 = arith.constant dense<0.000000e+00> : vector<1xf32>
      %48 = vector.multi_reduction <add>, %47, %cst_18 [1, 2] : vector<1x1x32xf32> to vector<1xf32>
      %49 = vector.shape_cast %48 : vector<1xf32> to vector<1x1x1xf32>
      %50 = vector.extract %49[0, 0, 0] : f32 from vector<1x1x1xf32>
      %cst_19 = arith.constant 0.000000e+00 : f32
      %51 = arith.subf %cst_19, %50 : f32
      %cst_20 = arith.constant 1.44269502 : f32
      %52 = arith.mulf %51, %cst_20 : f32
      %c0_21 = arith.constant 0 : index
      %c0_22 = arith.constant 0 : index
      %53 = memref.load %arg5[%c0_21, %c0_22] : memref<1x1xf32, #tpu.memory_space<smem>>
      %cst_23 = arith.constant 0.0178571437 : f32
      %54 = arith.mulf %53, %cst_23 : f32
      %55 = arith.subf %54, %52 : f32
      %c0_24 = arith.constant 0 : index
      %c0_25 = arith.constant 0 : index
      %56 = memref.load %arg4[%c0_24, %c0_25] : memref<1x1xf32, #tpu.memory_space<smem>>
      memref.store %55, %arg4[%c0_24, %c0_25] : memref<1x1xf32, #tpu.memory_space<smem>>
    } else {
    }
    return
  }
  func.func @transform_0(%arg0: i32) -> (i32, i32) {
    %c0_i32 = arith.constant 0 : i32
    %c0_i32_0 = arith.constant 0 : i32
    return %arg0, %c0_i32 : i32, i32
  }
  func.func @transform_1(%arg0: i32) -> (i32, i32) {
    %c0_i32 = arith.constant 0 : i32
    %c0_i32_0 = arith.constant 0 : i32
    return %arg0, %c0_i32 : i32, i32
  }
  func.func @transform_2(%arg0: i32) -> (i32, i32) {
    %c0_i32 = arith.constant 0 : i32
    %c0_i32_0 = arith.constant 0 : i32
    %c0_i32_1 = arith.constant 0 : i32
    return %c0_i32, %c0_i32_0 : i32, i32
  }
  func.func @transform_3(%arg0: i32) -> (i32, i32) {
    %c0_i32 = arith.constant 0 : i32
    %c0_i32_0 = arith.constant 0 : i32
    %c0_i32_1 = arith.constant 0 : i32
    return %c0_i32, %c0_i32_0 : i32, i32
  }
}

</mosaic_0001>

<bundles_post_ra>
// kernel: tpu_custom_call.1
= control target key start
LH: loop header
LB: loop body
LE: loop exit
PB: predicated region body
PF: predicated region fallthrough
CT: control target
= control target key end

     0   :  { %8 = vsyncpa [#allocation4], 0  ;;  %s487_s12 = smov 0   ;;  %s532_s0 = inlined_call_operand.vmem [shape: f32[56,32], index: 0, kind: input, shape index: {}]   ;;  %s533_s1 = inlined_call_operand.vmem [shape: s32[56,1], index: 1, kind: input, shape index: {}]   ;;  %s534_s2 = inlined_call_operand.vmem [shape: f32[1,32], index: 2, kind: input, shape index: {}]   ;;  %s535_s3 = inlined_call_operand.hbm [shape: f32[1,1], index: 3, kind: output, shape index: {}]  }
   0x1 LB: > { %s493_s13 = sadd.s32 4294967295, %s462_s12   ;;  %p392_p0 = scmp.ge.s32.totalorder %s462_s12, 1  ;;  %s462_s12 = sphi %s487_s12, %s14_s12  }
   0x2   : > { %p161_p1 = scmp.lt.s32.totalorder %s462_s12, 5 }
   0x4   : > { %p162_p2 = pnand %p392_p0, %p161_p1 }
   0x5   : > { %s393_s14 = sshll.u32 (!%p162_p2), %s493_s13, 1  ;;  %v464_v0 = vmov (!%p162_p2), 0   ;;  %vm231_vm0 = vcmask (!%p162_p2), 261120   ;;  %v256_v11 = vlaneseq (!%p162_p2)  ;;  %s398_s22 = sshll.u32 (!%p162_p2), %s493_s13, 4  ;;  %vm287_vm5 = vcmask (!%p162_p2), 7168  }
   0x6   : > { %165 = sbr.rel (%p162_p2) target bundleno = 576 (0x240), region = 32  ;;  %p198_p3 = scmp.lt.s32.totalorder (!%p162_p2), %s393_s14, 6  ;;  %428 = vset.pattern.permute.xlu1 (!%p162_p2), %v464_v0  ;;  %429 = vset.pattern.permute.xlu0 (!%p162_p2), %v464_v0  ;;  %v280_v28 = vstv (!%p162_p2), %s398_s22 }
   0x7   : > { %v257_v15 = vand.u32 (!%p162_p2), 127, %v256_v11  ;;  %v277_v27 = vshrl.u32 (!%p162_p2), %v256_v11, 7  ;;  %p414_p4 = scmp.eq.s32.totalorder (!%p162_p2), %s493_s13, 0  ;;  %s465_s23 = smov (!%p162_p2), 0.0  }
   0x8   : > { %p399_p5 = scmp.ne.s32.totalorder (!%p162_p2), %s493_s13, 3 }
   0x9   : > { %v278_v30 = vadd.s32 (!%p162_p2), 8, %v277_v27  ;;  %v281_v32 = vadd.s32 (!%p162_p2), %v280_v28, %v277_v27 }
   0xb   : > { %v282_v36 = vadd.s32 (!%p162_p2), %v280_v28, %v278_v30  ;;  %vm283_vm3 = vcmp.lt.s32.totalorder (!%p162_p2), %v281_v32, 56 }
   0xd   : > { %s537_s14 = smov (!%p198_p3, %s393_s14), 6  ;;  %vm284_vm4 = vcmp.lt.s32.totalorder %v282_v36, 56  ;;  %409 = sst [smem:[#allocation2]] (%p414_p4), %s465_s23 }
   0xe   : > { %s394_s15 = sshll.u32 %s537_s14, 3  ;;  %s300_s24 = sld [smem:[#allocation2]]  ;;  %v308_v54 = vld [vmem:[%s534_s2] sm:$0x1] (!%p399_p5)  ;;  %vm314_vm7 = vcmask (!%p399_p5), 253952  }
   0xf   : > { %s201_s18 = scalar_lea.vmem %s532_s0, %s394_s15  ;;  %s215_s21 = scalar_lea.vmem %s533_s1, %s394_s15  ;;  %vm309_vm6 = vcmp.gt.f32.partialorder (!%p399_p5), %v308_v54, 0.0 }
  0x10   : > { %v227_v1 = vld [vmem:[%s201_s18] sm:$0xff]  ;;  %v228_v2 = vld [vmem:[%s201_s18 + $0x8] sm:$0xff] }
  0x11   : > { %v229_v3 = vld [vmem:[%s215_s21] sm:$0xff]  ;;  %v232_v4 = vsel %vm231_vm0, %v227_v1, -inf  ;;  %v230_v5 = vld [vmem:[%s215_s21 + $0x8] sm:$0xff]  ;;  %v235_v6 = vsel %vm231_vm0, %v228_v2, -inf }
  0x12   : > { %259 = vperm.xlu1 %428, %v229_v3   ;;  %233 = vmax.xlane.f32.xlu0 %v232_v4 }
  0x16   : > { %262 = vperm.xlu1 %428, %v230_v5   ;;  %236 = vmax.xlane.f32.xlu0 %v235_v6 }
  0x91   : > { %v260_v14 = vpop.permute.xlu1 %259 }
  0x92   : > { %vm264_vm1 = vcmp.eq.s32.totalorder %v257_v15, %v260_v14 }
  0x93   : > { %v266_v18 = vsel %vm264_vm1, %v227_v1, 0.0 }
  0x94   : > { %v268_v20 = vsel %vm231_vm0, %v266_v18, 0.0 }
  0x95   : > { %v263_v16 = vpop.permute.xlu1 %262 }
  0x96   : > { %vm265_vm2 = vcmp.eq.s32.totalorder %v257_v15, %v263_v16 }
  0x97   : > { %v267_v22 = vsel %vm265_vm2, %v228_v2, 0.0 }
  0x98   : > { %v271_v24 = vsel %vm231_vm0, %v267_v22, 0.0 }
  0x9f   : > { %v234_v7 = vpop.xlane.xlu0 %233 }
  0xa0   : > { %v238_v8 = vsub.f32 %v227_v1, %v234_v7 }
  0xa2   : > { %v240_v9 = vmul.f32 1.442695, %v238_v8 }
  0xa3   : > { %v237_v10 = vpop.xlane.xlu0 %236 }
  0xa4   : > { %430 = vpow2.f32 %v240_v9  ;;  %v239_v12 = vsub.f32 %v228_v2, %v237_v10 }
  0xa6   : > { %v242_v13 = vmul.f32 1.442695, %v239_v12 }
  0xa8   : > { %432 = vpow2.f32 %v242_v13 }
  0xae   : > { %v431_v17 = vpop.eup %430 }
  0xaf   : > { %v244_v19 = vsel %vm231_vm0, %v431_v17, 0.0 }
  0xb0   : > { %245 = vadd.xlane.f32.xlu0 %v244_v19 }
  0xb2   : > { %v433_v21 = vpop.eup %432 }
  0xb3   : > { %v247_v23 = vsel %vm231_vm0, %v433_v21, 0.0 }
  0xb4   : > { %248 = vadd.xlane.f32.xlu1 %v247_v23  ;;  %269 = vadd.xlane.f32.xlu0 %v268_v20 }
  0xb8   : > { %272 = vadd.xlane.f32.xlu0 %v271_v24 }
 0x13d   : > { %v246_v25 = vpop.xlane.xlu0 %245 }
 0x13e   : > { %434 = vlog2.f32 %v246_v25 }
 0x141   : > { %v249_v26 = vpop.xlane.xlu1 %248  ;;  %v270_v33 = vpop.xlane.xlu0 %269 }
 0x142   : > { %436 = vlog2.f32 %v249_v26 }
 0x143   : > { %438 = vlog2.f32 (!%p399_p5), %v308_v54 }
 0x145   : > { %v273_v40 = vpop.xlane.xlu0 %272 }
 0x148   : > { %v435_v29 = vpop.eup %434 }
 0x149   : > { %v251_v31 = vmul.f32 0.6931472, %v435_v29 }
 0x14b   : > { %v254_v34 = vadd.f32 %v251_v31, %v234_v7 }
 0x14c   : > { %v437_v35 = vpop.eup %436 }
 0x14d   : > { %v253_v37 = vmul.f32 0.6931472, %v437_v35  ;;  %v274_v38 = vsub.f32 %v254_v34, %v270_v33  ;;  %v439_v55 = vpop.eup (!%p399_p5), %438 }
 0x14e   : > { %v311_v56 = vmul.f32 (!%p399_p5), 0.6931472, %v439_v55 }
 0x14f   : > { %v255_v39 = vadd.f32 %v253_v37, %v237_v10  ;;  %v285_v41 = vsel %vm283_vm3, %v274_v38, 0.0 }
 0x150   : > { %v288_v44 = vsel %vm287_vm5, %v285_v41, 0.0  ;;  %v312_v57 = vmul.f32 (!%p399_p5), %v311_v56, %v308_v54 }
 0x151   : > { %v275_v42 = vsub.f32 %v255_v39, %v273_v40 }
 0x152   : > { %v313_v58 = vsel (!%p399_p5), %vm309_vm6, %v312_v57, 0.0 }
 0x153   : > { %v286_v43 = vsel %vm284_vm4, %v275_v42, 0.0  ;;  %v315_v59 = vsel (!%p399_p5), %vm314_vm7, %v313_v58, 0.0 }
 0x154   : > { %v289_v45 = vsel %vm287_vm5, %v286_v43, 0.0 }
 0x155   : > { %v290_v46 = vadd.f32 %v289_v45, %v288_v44 }
 0x157   : > { %291 = vadd.xlane.f32.xlu0 %v290_v46 }
 0x15b   : > { %316 = vadd.xlane.f32.xlu0 (!%p399_p5), %v315_v59 }
 0x1e4   : > { %v292_v47 = vpop.xlane.xlu0 %291 }
 0x1e5   : > { %v293_v48 = vrot.slane %v292_v47, 4 }
 0x1e7   : > { %v294_v49 = vadd.f32 %v293_v48, %v292_v47 }
 0x1e8   : > { %v317_v60 = vpop.xlane.xlu0 (!%p399_p5), %316 }
 0x1e9   : > { %v295_v50 = vrot.slane %v294_v49, 2  ;;  %v318_v61 = vrot.slane (!%p399_p5), %v317_v60, 4 }
 0x1eb   : > { %v296_v51 = vadd.f32 %v295_v50, %v294_v49  ;;  %v319_v62 = vadd.f32 (!%p399_p5), %v318_v61, %v317_v60 }
 0x1ed   : > { %v297_v52 = vrot.slane %v296_v51, 1  ;;  %v320_v63 = vrot.slane (!%p399_p5), %v319_v62, 2 }
 0x1ef   : > { %v298_v53 = vadd.f32 %v297_v52, %v296_v51  ;;  %v321_v0 = vadd.f32 (!%p399_p5), %v320_v63, %v319_v62 }
 0x1f1   : > { %404 = vpush %v298_v53  ;;  %v322_v1 = vrot.slane (!%p399_p5), %v321_v0, 1 }
 0x1f3   : > { %v323_v2 = vadd.f32 (!%p399_p5), %v322_v1, %v321_v0 }
 0x1f5   : > { %406 = vpush (!%p399_p5), %v323_v2 }
 0x21f   : > { %307 = sbr.rel (%p399_p5) target bundleno = 561 (0x231), region = 40 }
 0x222   : > { %s405_s25 = spop %404 }
 0x223   : > { %s301_s26 = sadd.f32 %s405_s25, %s300_s24 }
 0x225   : > { %303 = sst [smem:[#allocation2]] %s301_s26 }
 0x226   : > { %s327_s29 = sld [smem:[#allocation2]]  ;;  %s407_s30 = spop %406 }
 0x227   : > { %s325_s4 = ssub.f32 0.0, %s407_s30 }
 0x229   : > { %s326_s6 = smul.f32 1.442695, %s325_s4 }
 0x22c   : > { %s328_s5 = smul.f32 0.017857144, %s327_s29 }
 0x22e   : > { %s329_s7 = ssub.f32 %s328_s5, %s326_s6 }
 0x230   : > { %331 = sst [smem:[#allocation3]] %s329_s7 }
 0x231 PF: > { %p415_p6 = scmp.eq.s32.totalorder %s493_s13, 3  ;;  %s440_s10 = scalar_lea.hbm %s535_s3, 16 }
 0x232   : > { %p441_p7 = scmp.ne.s32.totalorder %s535_s3, %s440_s10  ;;  %p446_p10 = scmp.lt.u32.totalorder %s440_s10, %s535_s3 }
 0x234   : > { %p442_p8 = pnand %p441_p7, %p415_p6 }
 0x236   : > { %p443_p9 = pneg %p442_p8 }
 0x238   : > { %p448_p11 = pnand %p446_p10, %p443_p9 }
 0x23a   : > { %451 = shalt.err (!%p448_p11)
}
 0x23b   : > { %s466_s17 = smov [#allocation3]  }
 0x23c   : > { %411 = dma.smem_to_hbm (%p415_p6), %s466_s17, 16, %s535_s3, [#allocation4]  }
 0x23d   : > { %457 = dma.done.wait (%p415_p6), [#allocation4], 16  }
 0x23e   : > { %459 = vsyncadd (%p415_p6), [#allocation4], 4294967280 }
 0x23f   : > { %345 = sfence }
 0x240 PF: > { %s14_s12 = sadd.s32 1, %s462_s12  }
 0x241   : > { %p11_p12 = scmp.ge.s32.totalorder %s14_s12, 6  }
 0x243   :  { %13 = sbr.rel (!%p11_p12) target bundleno = 1 (0x1), region = 73 }
 0x24a   :  { %351 = vsyncpa [#allocation4], 1 }
 0x24b   :  { %353 = vsyncpa [#allocation4 + $0x1], 1 }

</bundles_post_ra>
